<compile_context>
chip_gen: v7x
topology: tpu7x:2x2x1
jax: 0.10.0
libtpu: 0.0.40
codegen_flags: <defaults>
</compile_context>

<pallas_src>
import functools

import jax
import jax.numpy as jnp
from jax import lax
from jax.experimental import pallas as pl
from jax.experimental.pallas import tpu as pltpu

LEAKY_SLOPE = 0.01            # nn.LeakyReLU default negative_slope
EPS = 1e-6                    # E2T eps
LANES = 128
_VMEM_LIMIT = 32 * 1024 * 1024  # explicit scoped-VMEM budget (v5e/v6e/v7x safe)


def _cdiv(a, b):
    return -(-a // b)


def _round_up(a, b):
    return _cdiv(a, b) * b


# --------------------------------------------------------------------------
# Kernel 1: tiled mean-pool over HW  ->  MLP  ->  temperature (+ 1/temp).
#   grid = (n_k,) over HW chunks; partial lane-sums accumulate in a VMEM
#   scratch; the MLP + abs + eps + reciprocal run once on the last chunk.
# --------------------------------------------------------------------------
def temps_kernel(feats_ref, w0_ref, b0_ref, w1_ref, b1_ref, wo_ref, bo_ref,
                 temps_ref, inv_ref, acc_ref):
    k = pl.program_id(0)

    @pl.when(k == 0)
    def _():
        acc_ref[...] = jnp.zeros_like(acc_ref)

    # AdaptiveAvgPool2d((1,1)) == mean over HW. The 1/HW scale is folded into
    # w0 at trace time, so this is a pure lane reduction (XLU) per chunk.
    acc_ref[...] += jnp.sum(feats_ref[...], axis=-1)            # (B, F)

    @pl.when(k == pl.num_programs(0) - 1)
    def _():
        pooled = acc_ref[...]                                    # (B, F)

        # fc_0 + LeakyReLU
        x = jnp.dot(pooled, w0_ref[...],
                    preferred_element_type=jnp.float32) + b0_ref[...]
        x = jnp.where(x > 0, x, LEAKY_SLOPE * x)

        # fc_1 + LeakyReLU
        x = jnp.dot(x, w1_ref[...],
                    preferred_element_type=jnp.float32) + b1_ref[...]
        x = jnp.where(x > 0, x, LEAKY_SLOPE * x)

        # out_linear: features[-1] -> num_classes == 1 on the VPU
        # (elementwise mul + lane reduce) instead of an N=1 MXU matmul.
        t = jnp.sum(x * wo_ref[...], axis=-1, keepdims=True) + bo_ref[...]

        # temp_range is None -> temps = |t| ; smoothed = temps + eps
        temps = jnp.abs(t) + EPS
        temps_ref[...] = temps
        inv_ref[...] = 1.0 / temps          # per-sample reciprocal (B values)


# --------------------------------------------------------------------------
# Kernel 2: lane-dense, tiled  logits * (1/temp)  broadcast.
#   grid = (B * n_j,) flattened so both v7x TensorCores get work even at B=2.
# --------------------------------------------------------------------------
def scale_kernel(inv_ref, logits_ref, out_ref, *, n_j):
    b = pl.program_id(0) // n_j                 # which sample this tile is
    out_ref[...] = (logits_ref[...] * inv_ref[b]).astype(out_ref.dtype)


def e2t_forward(logits, image, params):
    B, C, H, W = logits.shape

    # --- glue: synthetic backbone.encode (3x3 conv, NCHW -> NCHW) ----------
    # TODO(synk): the real backbone.encode is model-specific; a 3x3 conv
    # stands in for it here (plain-JAX glue, not part of the Pallas hot path).
    x_feats = lax.conv_general_dilated(
        image, params["backbone_w"], window_strides=(1, 1), padding="SAME",
        dimension_numbers=("NCHW", "OIHW", "NCHW"))
    x_feats = x_feats + params["backbone_b"][None, :, None, None]

    Bf, F, Hf, Wf = x_feats.shape
    hw = Hf * Wf
    # NCHW -> (B, F, HW): pure reshape (no transpose); HW lands on the lanes.
    feats = x_feats.reshape(Bf, F, hw)

    # Fold the 1/HW pooling scale into the first linear layer (trace time).
    w0 = params["w0"] * (1.0 / hw)
    b0 = params["b0"]
    w1, b1 = params["w1"], params["b1"]
    wo, bo = params["wo"], params["bo"]
    nc = wo.shape[1]
    # TODO(synk): get_temp_map is not defined in the reference; implemented as
    # a per-sample scalar broadcast, which assumes num_classes == 1.
    assert nc == 1, "temp-map broadcast assumes one temperature per sample"
    wo_row = wo.reshape(1, -1)              # (1, F1): VPU path in the kernel

    # ---- kernel 1 tiling: stream feats in ~2 MiB lane-dense chunks --------
    bytes_per_lane = Bf * F * 4
    hw_tile = max(LANES,
                  ((2 * 1024 * 1024) // bytes_per_lane) // LANES * LANES)
    hw_tile = min(hw_tile, _round_up(hw, LANES))
    n_k = _cdiv(hw, hw_tile)
    hw_padded = n_k * hw_tile
    if hw_padded != hw:                     # zero-pad: does not change the sum
        feats = jnp.pad(feats, ((0, 0), (0, 0), (0, hw_padded - hw)))

    def _const(shape):                      # whole-array block, fixed index
        return pl.BlockSpec(shape, lambda k: (0,) * len(shape))

    temps, inv = pl.pallas_call(
        temps_kernel,
        grid=(n_k,),
        in_specs=[pl.BlockSpec((Bf, F, hw_tile), lambda k: (0, 0, k)),
                  _const(w0.shape), _const(b0.shape),
                  _const(w1.shape), _const(b1.shape),
                  _const(wo_row.shape), _const(bo.shape)],
        out_specs=[_const((B, 1)), _const((B, 1))],
        out_shape=[jax.ShapeDtypeStruct((B, 1), jnp.float32),
                   jax.ShapeDtypeStruct((B, 1), jnp.float32)],
        scratch_shapes=[pltpu.VMEM((Bf, F), jnp.float32)],
        compiler_params=pltpu.CompilerParams(
            dimension_semantics=("arbitrary",),      # HW chunks: reduction
            vmem_limit_bytes=_VMEM_LIMIT),
    )(feats, w0, b0, w1, b1, wo_row, bo)

    # ---- kernel 2: lane-dense padded slab, ~1 MiB row tiles, flat grid ----
    chw = C * H * W
    R = _cdiv(chw, LANES)                   # 128-lane rows after lane padding
    n_j = _cdiv(R, 2048)                    # ~1 MiB f32 per row-tile target
    r_tile = _round_up(_cdiv(R, n_j), 8)    # balanced, sublane-multiple tiles
    R_pad = n_j * r_tile

    logits_flat = logits.reshape(B, chw)
    pad = R_pad * LANES - chw
    if pad:
        logits_flat = jnp.pad(logits_flat, ((0, 0), (0, pad)))
    logits3 = logits_flat.reshape(B, R_pad, LANES)
    inv_smem = inv.reshape(B)               # per-sample 1/temp, SMEM resident

    idx = lambda i: (i // n_j, i % n_j, 0)
    out3 = pl.pallas_call(
        functools.partial(scale_kernel, n_j=n_j),
        grid=(B * n_j,),
        in_specs=[pl.BlockSpec(memory_space=pltpu.MemorySpace.SMEM),
                  pl.BlockSpec((1, r_tile, LANES), idx)],
        out_specs=pl.BlockSpec((1, r_tile, LANES), idx),
        out_shape=jax.ShapeDtypeStruct((B, R_pad, LANES), logits.dtype),
        compiler_params=pltpu.CompilerParams(
            dimension_semantics=("parallel",),
            vmem_limit_bytes=_VMEM_LIMIT),
    )(inv_smem, logits3)

    scaled = out3.reshape(B, R_pad * LANES)[:, :chw].reshape(B, C, H, W)
    return scaled, temps


def init_params(key, in_channels=4, in_features=32, features=(64, 32),
                num_classes=1):
    ks = jax.random.split(key, 8)
    scale = 0.1
    params = {
        # synthetic backbone: 3x3 conv, in_channels -> in_features
        "backbone_w": scale * jax.random.normal(
            ks[0], (in_features, in_channels, 3, 3), jnp.float32),
        "backbone_b": scale * jax.random.normal(
            ks[1], (in_features,), jnp.float32),
        # fc_0: Linear(in_features, features[0]) — stored as (in, out)
        "w0": scale * jax.random.normal(
            ks[2], (in_features, features[0]), jnp.float32),
        "b0": scale * jax.random.normal(ks[3], (1, features[0]), jnp.float32),
        # fc_1: Linear(features[0], features[1])
        "w1": scale * jax.random.normal(
            ks[4], (features[0], features[1]), jnp.float32),
        "b1": scale * jax.random.normal(ks[5], (1, features[1]), jnp.float32),
        # out_linear: Linear(features[-1], num_classes)
        "wo": scale * jax.random.normal(
            ks[6], (features[1], num_classes), jnp.float32),
        "bo": scale * jax.random.normal(ks[7], (1, num_classes), jnp.float32),
    }
    return params


def _reference(logits, image, params):
    # pure-JAX reference (mirrors the PyTorch forward) for a sanity check
    xf = lax.conv_general_dilated(
        image, params["backbone_w"], (1, 1), "SAME",
        dimension_numbers=("NCHW", "OIHW", "NCHW"))
    xf = xf + params["backbone_b"][None, :, None, None]
    pooled = xf.mean(axis=(2, 3))
    hi = lax.Precision.HIGHEST
    x = jnp.dot(pooled, params["w0"], precision=hi) + params["b0"]
    x = jnp.where(x > 0, x, LEAKY_SLOPE * x)
    x = jnp.dot(x, params["w1"], precision=hi) + params["b1"]
    x = jnp.where(x > 0, x, LEAKY_SLOPE * x)
    t = jnp.dot(x, params["wo"], precision=hi) + params["bo"]
    temps = jnp.abs(t) + EPS
    return logits / temps[:, :, None, None], temps


if __name__ == "__main__":
    key = jax.random.PRNGKey(0)
    k_img, k_log, k_par = jax.random.split(key, 3)

    B, C, H, W = 2, 4, 16, 16          # logits: (B, num_classes_logits, H, W)
    image = jax.random.normal(k_img, (B, C, H, W), jnp.float32)
    logits = jax.random.normal(k_log, (B, C, H, W), jnp.float32)

    # in_features=32, features=[64, 32], num_classes=1 (one temperature/sample)
    params = init_params(k_par, in_channels=C, in_features=32,
                         features=(64, 32), num_classes=1)

    scaled_logits, temps = e2t_forward(logits, image, params)
    jax.block_until_ready((scaled_logits, temps))

    assert scaled_logits.shape == logits.shape
    assert temps.shape == (B, 1)

    # sanity check vs pure-JAX reference (loose tol: reciprocal-multiply vs
    # divide, folded 1/HW, MXU vs XLA matmul rounding)
    ref_scaled, ref_temps = _reference(logits, image, params)
    assert bool(jnp.all(jnp.isfinite(scaled_logits)))
    assert bool(jnp.allclose(temps, ref_temps, rtol=5e-2, atol=1e-5))
    assert bool(jnp.allclose(scaled_logits, ref_scaled, rtol=5e-2, atol=1e-4))

    print("KERNEL_OK")
</pallas_src>

<mosaic_0001>
module attributes {stable_mosaic.version = 11 : i64} {
  func.func @temps_kernel(%arg0: i32, %arg1: memref<2x32x256xf32, #tpu.memory_space<vmem>>, %arg2: memref<32x64xf32, #tpu.memory_space<vmem>>, %arg3: memref<1x64xf32, #tpu.memory_space<vmem>>, %arg4: memref<64x32xf32, #tpu.memory_space<vmem>>, %arg5: memref<1x32xf32, #tpu.memory_space<vmem>>, %arg6: memref<1x32xf32, #tpu.memory_space<vmem>>, %arg7: memref<1x1xf32, #tpu.memory_space<vmem>>, %arg8: memref<2x1xf32, #tpu.memory_space<vmem>>, %arg9: memref<2x1xf32, #tpu.memory_space<vmem>>, %arg10: memref<2x32xf32, #tpu.memory_space<vmem>>) attributes {dimension_semantics = [#tpu.dimension_semantics<arbitrary>], iteration_bounds = array<i64: 1>, scalar_prefetch = 0 : i64, scratch_operands = 1 : i64, tpu.core_type = #tpu.core_type<tc>, window_params = [{transform_indices = @transform_0, window_bounds = array<i64: 2, 32, 256>}, {pipeline_mode = #tpu.pipeline_mode<synchronous>, transform_indices = @transform_1, window_bounds = array<i64: 32, 64>}, {pipeline_mode = #tpu.pipeline_mode<synchronous>, transform_indices = @transform_2, window_bounds = array<i64: 1, 64>}, {pipeline_mode = #tpu.pipeline_mode<synchronous>, transform_indices = @transform_3, window_bounds = array<i64: 64, 32>}, {pipeline_mode = #tpu.pipeline_mode<synchronous>, transform_indices = @transform_4, window_bounds = array<i64: 1, 32>}, {pipeline_mode = #tpu.pipeline_mode<synchronous>, transform_indices = @transform_5, window_bounds = array<i64: 1, 32>}, {pipeline_mode = #tpu.pipeline_mode<synchronous>, transform_indices = @transform_6, window_bounds = array<i64: 1, 1>}, {pipeline_mode = #tpu.pipeline_mode<synchronous>, transform_indices = @transform_7, window_bounds = array<i64: 2, 1>}, {pipeline_mode = #tpu.pipeline_mode<synchronous>, transform_indices = @transform_8, window_bounds = array<i64: 2, 1>}]} {
    %c0_i32 = arith.constant 0 : i32
    %0 = arith.cmpi eq, %arg0, %c0_i32 : i32
    %1 = arith.extui %0 : i1 to i32
    %c0_i32_0 = arith.constant 0 : i32
    %2 = arith.cmpi ne, %1, %c0_i32_0 : i32
    scf.if %2 {
      %cst_9 = arith.constant 0.000000e+00 : f32
      %11 = vector.broadcast %cst_9 : f32 to vector<2x32xf32>
      %c0_10 = arith.constant 0 : index
      %c0_11 = arith.constant 0 : index
      %12 = vector.load %arg10[%c0_10, %c0_11] : memref<2x32xf32, #tpu.memory_space<vmem>>, vector<2x32xf32>
      tpu.vector_store %arg10[%c0_10, %c0_11], %11 {strides = array<i32>} : memref<2x32xf32, #tpu.memory_space<vmem>>, vector<2x32xf32>,
    } else {
    }
    %c0 = arith.constant 0 : index
    %c0_1 = arith.constant 0 : index
    %3 = vector.load %arg10[%c0, %c0_1] : memref<2x32xf32, #tpu.memory_space<vmem>>, vector<2x32xf32>
    %c0_2 = arith.constant 0 : index
    %c0_3 = arith.constant 0 : index
    %c0_4 = arith.constant 0 : index
    %4 = vector.load %arg1[%c0_2, %c0_3, %c0_4] : memref<2x32x256xf32, #tpu.memory_space<vmem>>, vector<2x32x256xf32>
    %cst = arith.constant dense<0.000000e+00> : vector<2x32xf32>
    %5 = vector.multi_reduction <add>, %4, %cst [2] : vector<2x32x256xf32> to vector<2x32xf32>
    %6 = arith.addf %3, %5 : vector<2x32xf32>
    %c0_5 = arith.constant 0 : index
    %c0_6 = arith.constant 0 : index
    %7 = vector.load %arg10[%c0_5, %c0_6] : memref<2x32xf32, #tpu.memory_space<vmem>>, vector<2x32xf32>
    tpu.vector_store %arg10[%c0_5, %c0_6], %6 {strides = array<i32>} : memref<2x32xf32, #tpu.memory_space<vmem>>, vector<2x32xf32>,
    %c0_i32_7 = arith.constant 0 : i32
    %8 = arith.cmpi eq, %arg0, %c0_i32_7 : i32
    %9 = arith.extui %8 : i1 to i32
    %c0_i32_8 = arith.constant 0 : i32
    %10 = arith.cmpi ne, %9, %c0_i32_8 : i32
    scf.if %10 {
      %c0_9 = arith.constant 0 : index
      %c0_10 = arith.constant 0 : index
      %11 = vector.load %arg10[%c0_9, %c0_10] : memref<2x32xf32, #tpu.memory_space<vmem>>, vector<2x32xf32>
      %c0_11 = arith.constant 0 : index
      %c0_12 = arith.constant 0 : index
      %12 = vector.load %arg2[%c0_11, %c0_12] : memref<32x64xf32, #tpu.memory_space<vmem>>, vector<32x64xf32>
      %cst_13 = arith.constant dense<0.000000e+00> : vector<2x64xf32>
      %13 = tpu.matmul %11, %12, %cst_13 {dimension_numbers = #tpu.dot_dimension_numbers<[1], [0], [0], [1], [0, 0, 1, 1], [], []>} : vector<2x32xf32>, vector<32x64xf32>, vector<2x64xf32> -> vector<2x64xf32>
      %c0_14 = arith.constant 0 : index
      %c0_15 = arith.constant 0 : index
      %14 = vector.load %arg3[%c0_14, %c0_15] : memref<1x64xf32, #tpu.memory_space<vmem>>, vector<1x64xf32>
      %15 = vector.broadcast %14 : vector<1x64xf32> to vector<2x64xf32>
      %16 = arith.addf %13, %15 : vector<2x64xf32>
      %cst_16 = arith.constant 0.000000e+00 : f32
      %17 = vector.broadcast %cst_16 : f32 to vector<2x64xf32>
      %18 = arith.cmpf ogt, %16, %17 : vector<2x64xf32>
      %cst_17 = arith.constant 0.00999999977 : f32
      %19 = vector.broadcast %cst_17 : f32 to vector<2x64xf32>
      %20 = arith.mulf %19, %16 : vector<2x64xf32>
      %21 = arith.select %18, %16, %20 : vector<2x64xi1>, vector<2x64xf32>
      %c0_18 = arith.constant 0 : index
      %c0_19 = arith.constant 0 : index
      %22 = vector.load %arg4[%c0_18, %c0_19] : memref<64x32xf32, #tpu.memory_space<vmem>>, vector<64x32xf32>
      %cst_20 = arith.constant dense<0.000000e+00> : vector<2x32xf32>
      %23 = tpu.matmul %21, %22, %cst_20 {dimension_numbers = #tpu.dot_dimension_numbers<[1], [0], [0], [1], [0, 0, 1, 1], [], []>} : vector<2x64xf32>, vector<64x32xf32>, vector<2x32xf32> -> vector<2x32xf32>
      %c0_21 = arith.constant 0 : index
      %c0_22 = arith.constant 0 : index
      %24 = vector.load %arg5[%c0_21, %c0_22] : memref<1x32xf32, #tpu.memory_space<vmem>>, vector<1x32xf32>
      %25 = vector.broadcast %24 : vector<1x32xf32> to vector<2x32xf32>
      %26 = arith.addf %23, %25 : vector<2x32xf32>
      %cst_23 = arith.constant 0.000000e+00 : f32
      %27 = vector.broadcast %cst_23 : f32 to vector<2x32xf32>
      %28 = arith.cmpf ogt, %26, %27 : vector<2x32xf32>
      %cst_24 = arith.constant 0.00999999977 : f32
      %29 = vector.broadcast %cst_24 : f32 to vector<2x32xf32>
      %30 = arith.mulf %29, %26 : vector<2x32xf32>
      %31 = arith.select %28, %26, %30 : vector<2x32xi1>, vector<2x32xf32>
      %c0_25 = arith.constant 0 : index
      %c0_26 = arith.constant 0 : index
      %32 = vector.load %arg6[%c0_25, %c0_26] : memref<1x32xf32, #tpu.memory_space<vmem>>, vector<1x32xf32>
      %33 = vector.broadcast %32 : vector<1x32xf32> to vector<2x32xf32>
      %34 = arith.mulf %31, %33 : vector<2x32xf32>
      %cst_27 = arith.constant dense<0.000000e+00> : vector<2xf32>
      %35 = vector.multi_reduction <add>, %34, %cst_27 [1] : vector<2x32xf32> to vector<2xf32>
      %36 = vector.shape_cast %35 : vector<2xf32> to vector<2x1xf32>
      %c0_28 = arith.constant 0 : index
      %c0_29 = arith.constant 0 : index
      %37 = vector.load %arg7[%c0_28, %c0_29] : memref<1x1xf32, #tpu.memory_space<vmem>>, vector<1x1xf32>
      %38 = vector.broadcast %37 : vector<1x1xf32> to vector<2x1xf32>
      %39 = arith.addf %36, %38 : vector<2x1xf32>
      %40 = math.absf %39 : vector<2x1xf32>
      %cst_30 = arith.constant 9.99999997E-7 : f32
      %41 = vector.broadcast %cst_30 : f32 to vector<2x1xf32>
      %42 = arith.addf %40, %41 : vector<2x1xf32>
      %c0_31 = arith.constant 0 : index
      %c0_32 = arith.constant 0 : index
      %43 = vector.load %arg8[%c0_31, %c0_32] : memref<2x1xf32, #tpu.memory_space<vmem>>, vector<2x1xf32>
      tpu.vector_store %arg8[%c0_31, %c0_32], %42 {strides = array<i32>} : memref<2x1xf32, #tpu.memory_space<vmem>>, vector<2x1xf32>,
      %cst_33 = arith.constant 1.000000e+00 : f32
      %44 = vector.broadcast %cst_33 : f32 to vector<2x1xf32>
      %45 = arith.divf %44, %42 : vector<2x1xf32>
      %c0_34 = arith.constant 0 : index
      %c0_35 = arith.constant 0 : index
      %46 = vector.load %arg9[%c0_34, %c0_35] : memref<2x1xf32, #tpu.memory_space<vmem>>, vector<2x1xf32>
      tpu.vector_store %arg9[%c0_34, %c0_35], %45 {strides = array<i32>} : memref<2x1xf32, #tpu.memory_space<vmem>>, vector<2x1xf32>,
    } else {
    }
    return
  }
  func.func @transform_0(%arg0: i32) -> (i32, i32, i32) {
    %c0_i32 = arith.constant 0 : i32
    %c0_i32_0 = arith.constant 0 : i32
    %c0_i32_1 = arith.constant 0 : i32
    return %c0_i32, %c0_i32_0, %arg0 : i32, i32, i32
  }
  func.func @transform_1(%arg0: i32) -> (i32, i32) {
    %c0_i32 = arith.constant 0 : i32
    %c0_i32_0 = arith.constant 0 : i32
    %c0_i32_1 = arith.constant 0 : i32
    return %c0_i32, %c0_i32_0 : i32, i32
  }
  func.func @transform_2(%arg0: i32) -> (i32, i32) {
    %c0_i32 = arith.constant 0 : i32
    %c0_i32_0 = arith.constant 0 : i32
    %c0_i32_1 = arith.constant 0 : i32
    return %c0_i32, %c0_i32_0 : i32, i32
  }
  func.func @transform_3(%arg0: i32) -> (i32, i32) {
    %c0_i32 = arith.constant 0 : i32
    %c0_i32_0 = arith.constant 0 : i32
    %c0_i32_1 = arith.constant 0 : i32
    return %c0_i32, %c0_i32_0 : i32, i32
  }
  func.func @transform_4(%arg0: i32) -> (i32, i32) {
    %c0_i32 = arith.constant 0 : i32
    %c0_i32_0 = arith.constant 0 : i32
    %c0_i32_1 = arith.constant 0 : i32
    return %c0_i32, %c0_i32_0 : i32, i32
  }
  func.func @transform_5(%arg0: i32) -> (i32, i32) {
    %c0_i32 = arith.constant 0 : i32
    %c0_i32_0 = arith.constant 0 : i32
    %c0_i32_1 = arith.constant 0 : i32
    return %c0_i32, %c0_i32_0 : i32, i32
  }
  func.func @transform_6(%arg0: i32) -> (i32, i32) {
    %c0_i32 = arith.constant 0 : i32
    %c0_i32_0 = arith.constant 0 : i32
    %c0_i32_1 = arith.constant 0 : i32
    return %c0_i32, %c0_i32_0 : i32, i32
  }
  func.func @transform_7(%arg0: i32) -> (i32, i32) {
    %c0_i32 = arith.constant 0 : i32
    %c0_i32_0 = arith.constant 0 : i32
    %c0_i32_1 = arith.constant 0 : i32
    return %c0_i32, %c0_i32_0 : i32, i32
  }
  func.func @transform_8(%arg0: i32) -> (i32, i32) {
    %c0_i32 = arith.constant 0 : i32
    %c0_i32_0 = arith.constant 0 : i32
    %c0_i32_1 = arith.constant 0 : i32
    return %c0_i32, %c0_i32_0 : i32, i32
  }
}

</mosaic_0001>

<bundles_post_ra>
// kernel: tpu_custom_call.1
= control target key start
LH: loop header
LB: loop body
LE: loop exit
PB: predicated region body
PF: predicated region fallthrough
CT: control target
= control target key end

     0   :  { %s590_s0 = inlined_call_operand.hbm [shape: f32[2,32,256], index: 0, kind: input, shape index: {}]   ;;  %s591_s1 = inlined_call_operand.vmem [shape: f32[32,64], index: 1, kind: input, shape index: {}]   ;;  %s592_s2 = inlined_call_operand.vmem [shape: f32[1,64], index: 2, kind: input, shape index: {}]   ;;  %s593_s3 = inlined_call_operand.vmem [shape: f32[64,32], index: 3, kind: input, shape index: {}]   ;;  %s594_s4 = inlined_call_operand.vmem [shape: f32[1,32], index: 4, kind: input, shape index: {}]   ;;  %s595_s5 = inlined_call_operand.vmem [shape: f32[1,32], index: 5, kind: input, shape index: {}]   ;;  %s596_s6 = inlined_call_operand.<no memory space> [shape: f32[1,1], index: 6, kind: input, shape index: {}]   ;;  %s597_s7 = inlined_call_operand.vmem [shape: f32[2,1], index: 7, kind: output, shape index: {0}]   ;;  %s598_s8 = inlined_call_operand.vmem [shape: f32[2,1], index: 8, kind: output, shape index: {1}]  }
   0x1   :  { %v14_v0 = vstv %s596_s6 }
   0x2   :  { %15 = vst [vmem:[#allocation3] sm:$0x1] %v14_v0 }
   0x3   :  { %16 = vsyncpa [#allocation5], 0  ;;  %s470_s29 = smov [#allocation4]   ;;  %s446_s11 = scalar_lea.hbm %s590_s0, 2048 }
   0x4   :  { %s22_s30 = sshll.u32 %s470_s29, 4  ;;  %p447_p0 = scmp.ne.s32.totalorder %s590_s0, %s446_s11  ;;  %s23_s30 = int_to_ptr.vmem [resolvable:$true] %s22_s30 }
   0x5   :  { %p450_p1 = scmp.lt.u32.totalorder %s446_s11, %s590_s0 }
   0x7   :  { %p452_p2 = pnand %p450_p1, %p447_p0 }
   0x9   :  { %455 = shalt.err (!%p452_p2)
}
   0xa   :  { %s456_s6 = scalar_lea.vmem %s23_s30, 2048  ;;  %p461_p4 = scmp.lt.s32.totalorder %s23_s30, %s23_s30 }
   0xb   :  { %p457_p3 = scmp.ne.s32.totalorder %s23_s30, %s456_s6  ;;  %p462_p5 = scmp.lt.s32.totalorder %s456_s6, %s456_s6 }
   0xd   :  { %p463_p6 = por %p462_p5, %p461_p4 }
   0xf   :  { %p464_p7 = pnand %p463_p6, %p457_p3 }
  0x11   :  { %467 = shalt.err (!%p464_p7)
}
  0x12   :  { %s471_s16 = smov 256   ;;  %s472_s17 = smov 16  }
  0x13   :  { %28 = dma.hbm_to_vmem [thread:$0]  %s590_s0, 2048, %s23_s30, [#allocation5], %s471_s16, %s471_s16, %s472_s17  }
  0x14   :  { %468 = dma.done.wait [#allocation5], 2048  }
  0x15   :  { %469 = vsyncadd [#allocation5], 4294965248  ;;  %v59_v1 = vld [vmem:[#allocation4 + $0x40] sm:$0xff]  ;;  %v60_v2 = vld [vmem:[#allocation4 + $0x48] sm:$0xff]  ;;  %vm48_vm0 = vcmask 254976   ;;  %v473_v25 = vmov 0.0   ;;  %v99_v42 = vlaneseq }
  0x16   :  { %v51_v3 = vld [vmem:[#allocation4] sm:$0xff]  ;;  %v79_v4 = vadd.f32 %v60_v2, %v59_v1  ;;  %v52_v5 = vld [vmem:[#allocation4 + $0x8] sm:$0xff]  ;;  %v61_v6 = vld [vmem:[#allocation4 + $0x50] sm:$0xff]  ;;  %49 = vst.msk [vmem:[#allocation2] sm:$0x3] %vm48_vm0, %v473_v25  ;;  %v474_v29 = vmov 0.0|0.0  }
  0x17   :  { %v62_v7 = vld [vmem:[#allocation4 + $0x58] sm:$0xff]  ;;  %v67_v8 = vadd.f32 %v52_v5, %v51_v3  ;;  %v53_v9 = vld [vmem:[#allocation4 + $0x10] sm:$0xff]  ;;  %v63_v13 = vld [vmem:[#allocation4 + $0x60] sm:$0xff]  ;;  %420 = vmatprep.subr.bf16.mxu0 %v474_v29  ;;  %426 = vmatprep.subr.bf16.mxu1 %v474_v29  ;;  %vm475_vm1 = vmmov 0   ;;  %v100_v43 = vand.u32 127, %v99_v42  ;;  %v102_v48 = vshrl.u32 %v99_v42, 7 }
  0x18   :  { %v54_v10 = vld [vmem:[#allocation4 + $0x18] sm:$0xff]  ;;  %80 = vadd.xlane.f32.xlu1 %v79_v4  ;;  %v82_v11 = vadd.f32 %v62_v7, %v61_v6  ;;  %v64_v14 = vld [vmem:[#allocation4 + $0x68] sm:$0xff]  ;;  %v55_v15 = vld [vmem:[#allocation4 + $0x20] sm:$0xff]  ;;  %398 = vmatprep.mubr.msk.f32.mxu0 %vm475_vm1, %v473_v25  ;;  %vm110_vm2 = vcmask 130112   ;;  %vm117_vm3 = vcmask 195712   ;;  %vm124_vm4 = vcmask 261312  }
  0x19   :  { %68 = vadd.xlane.f32.xlu0 %v67_v8  ;;  %v70_v12 = vadd.f32 %v54_v10, %v53_v9  ;;  %v56_v16 = vld [vmem:[#allocation4 + $0x28] sm:$0xff]  ;;  %v85_v17 = vadd.f32 %v64_v14, %v63_v13  ;;  %v65_v19 = vld [vmem:[#allocation4 + $0x70] sm:$0xff]  ;;  %v66_v20 = vld [vmem:[#allocation4 + $0x78] sm:$0xff]  ;;  %417 = vmatprep.mubr.msk.f32.mxu1 %vm475_vm1, %v473_v25  ;;  %v105_v46 = vadd.s32 4294967288, %v100_v43  ;;  %v112_v47 = vadd.s32 4294967280, %v100_v43 }
  0x1a   :  { %v73_v18 = vadd.f32 %v56_v16, %v55_v15  ;;  %v57_v21 = vld [vmem:[#allocation4 + $0x30] sm:$0xff]  ;;  %v58_v22 = vld [vmem:[#allocation4 + $0x38] sm:$0xff]  ;;  %v88_v23 = vadd.f32 %v66_v20, %v65_v19  ;;  %v156_v27 = vld [vmem:[%s591_s1 + $0x8] sm:$0xff]  ;;  %v119_v52 = vadd.s32 4294967272, %v100_v43  ;;  %v103_v54 = vsub.s32 %v100_v43, %v102_v48 }
  0x1b   :  { %v76_v24 = vadd.f32 %v58_v22, %v57_v21  ;;  %v155_v26 = vld [vmem:[%s591_s1] sm:$0xff]  ;;  %v157_v28 = vld [vmem:[%s591_s1 + $0x10] sm:$0xff]  ;;  %v158_v31 = vld [vmem:[%s591_s1 + $0x18] sm:$0xff]  ;;  %v108_v50 = vsub.s32 %v105_v46, %v102_v48  ;;  %v115_v53 = vsub.s32 %v112_v47, %v102_v48  ;;  %vm145_vm5 = vcmask 1041409  }
  0x1c   :  { %83 = vadd.xlane.f32.xlu1 %v82_v11  ;;  %v421_v30 = vpack.c.bf16 %v156_v27, %v155_v26  ;;  %v424_v32 = vpack.c.bf16 %v158_v31, %v157_v28  ;;  %v243_v33 = vld [vmem:[%s593_s3] sm:$0xff]  ;;  %v244_v34 = vld [vmem:[%s593_s3 + $0x8] sm:$0xff]  ;;  %v245_v35 = vld [vmem:[%s593_s3 + $0x10] sm:$0xff]  ;;  %v122_v58 = vsub.s32 %v119_v52, %v102_v48  ;;  %vm166_vm6 = vcmask 261120  }
  0x1d   :  { %71 = vadd.xlane.f32.xlu0 %v70_v12  ;;  %v427_v36 = vpack.c.bf16 %v244_v34, %v243_v33  ;;  %v246_v37 = vld [vmem:[%s593_s3 + $0x18] sm:$0xff]  ;;  %v247_v39 = vld [vmem:[%s593_s3 + $0x20] sm:$0xff]  ;;  %v248_v40 = vld [vmem:[%s593_s3 + $0x28] sm:$0xff]  ;;  %vm258_vm8 = vcmask 523264   ;;  %vm356_vm10 = vcmask 1024  }
  0x1e   :  { %422 = vmatpush3.bf16.msra.mxu0 %v421_v30  ;;  %v430_v38 = vpack.c.bf16 %v246_v37, %v245_v35  ;;  %v433_v41 = vpack.c.bf16 %v248_v40, %v247_v39  ;;  %v50_v9 = vld [vmem:[#allocation2] sm:$0x3]  ;;  %v249_v14 = vld [vmem:[%s593_s3 + $0x30] sm:$0xff]  ;;  %v250_v15 = vld [vmem:[%s593_s3 + $0x38] sm:$0xff] }
  0x1f   :  { %423 = vmatprep.subr.bf16.mxu0 %v474_v29  ;;  %428 = vmatpush3.bf16.msra.mxu1 %v427_v36  ;;  %v436_v16 = vpack.c.bf16 %v250_v15, %v249_v14  ;;  %v374_v28 = vld [vmem:[%s595_s5] ss:$0 sm:$0xff] }
  0x20   :  { %86 = vadd.xlane.f32.xlu1 %v85_v17  ;;  %429 = vmatprep.subr.bf16.mxu1 %v474_v29  ;;  %v370_v17 = vld [vmem:[%s592_s2] ss:$0 sm:$0xff] }
  0x21   :  { %74 = vadd.xlane.f32.xlu0 %v73_v18 }
  0x22   :  { %425 = vmatpush3.bf16.msra.mxu0 %v424_v32  ;;  %v375_v32 = vld [vmem:[#allocation3] ss:$0 sm:$0xff] }
  0x23   :  { %431 = vmatpush3.bf16.msra.mxu1 %v430_v38 }
  0x24   :  { %89 = vadd.xlane.f32.xlu1 %v88_v23  ;;  %432 = vmatprep.subr.bf16.mxu1 %v474_v29  ;;  %v372_v23 = vld [vmem:[%s594_s4] ss:$0 sm:$0xff] }
  0x25   :  { %77 = vadd.xlane.f32.xlu0 %v76_v24 }
  0x27   :  { %434 = vmatpush3.bf16.msra.mxu1 %v433_v41 }
  0x28   :  { %435 = vmatprep.subr.bf16.mxu1 %v474_v29 }
  0x2b   :  { %437 = vmatpush3.bf16.msra.mxu1 %v436_v16 }
  0xa5   :  { %v81_v44 = vpop.xlane.xlu1 %80 }
  0xa6   :  { %v69_v45 = vpop.xlane.xlu0 %68  ;;  %v129_v61 = vrot.slane %v81_v44, %v103_v54 }
  0xa7   :  { %v104_v63 = vrot.slane %v69_v45, %v103_v54 }
  0xa9   :  { %v84_v49 = vpop.xlane.xlu1 %83 }
  0xaa   :  { %v72_v51 = vpop.xlane.xlu0 %71  ;;  %v133_v56 = vrot.slane %v84_v49, %v108_v50 }
  0xab   :  { %v109_v59 = vrot.slane %v72_v51, %v108_v50 }
  0xac   :  { %v134_v1 = vsel %vm110_vm2, %v133_v56, %v129_v61 }
  0xad   :  { %v87_v55 = vpop.xlane.xlu1 %86  ;;  %v111_v4 = vsel %vm110_vm2, %v109_v59, %v104_v63 }
  0xae   :  { %v75_v57 = vpop.xlane.xlu0 %74  ;;  %v138_v60 = vrot.slane %v87_v55, %v115_v53 }
  0xaf   :  { %v116_v62 = vrot.slane %v75_v57, %v115_v53 }
  0xb0   :  { %v139_v5 = vsel %vm117_vm3, %v138_v60, %v134_v1 }
  0xb1   :  { %v90_v0 = vpop.xlane.xlu1 %89  ;;  %v118_v7 = vsel %vm117_vm3, %v116_v62, %v111_v4 }
  0xb2   :  { %v143_v2 = vrot.slane %v90_v0, %v122_v58  ;;  %v78_v3 = vpop.xlane.xlu0 %77 }
  0xb3   :  { %v123_v6 = vrot.slane %v78_v3, %v122_v58 }
  0xb4   :  { %v144_v8 = vsel %vm124_vm4, %v143_v2, %v139_v5 }
  0xb5   :  { %v125_v10 = vsel %vm124_vm4, %v123_v6, %v118_v7 }
  0xb6   :  { %v146_v11 = vsel %vm145_vm5, %v144_v8, %v125_v10 }
  0xb7   :  { %v148_v12 = vadd.f32 %v146_v11, %v50_v9 }
  0xb9   :  { %150 = vst.msk [vmem:[#allocation2] sm:$0x3] %vm48_vm0, %v148_v12 }
  0xc0   :  { %v154_v13 = vld [vmem:[#allocation2] sm:$0x3] }
  0xc1   :  { %399 = vmatmul.mubr.msk.f32.vlgmr.msra.gmra.mrb[0].mxu0 %vm166_vm6, %v154_v13 }
 0x194   :  { %v236_v18 = vpop.f32.mrb[0].mxu0 }
 0x195   :  { %v237_v19 = vadd.f32 %v370_v17, %v236_v18  ;;  %v400_v20 = vpop.f32.mrb[1].mxu0 }
 0x197   :  { %vm240_vm7 = vcmp.gt.f32.partialorder %v237_v19, 0.0  ;;  %v241_v21 = vmul.f32 0.01, %v237_v19 }
 0x199   :  { %v242_v22 = vsel %vm240_vm7, %v237_v19, %v241_v21 }
 0x19a   :  { %418 = vmatmul.mubr.msk.f32.vlgmr.msra.gmra.mrb[0].mxu1 %vm258_vm8, %v242_v22 }
 0x26d   :  { %v328_v24 = vpop.f32.mrb[0].mxu1 }
 0x26e   :  { %v329_v25 = vadd.f32 %v372_v23, %v328_v24  ;;  %v419_v26 = vpop.f32.mrb[1].mxu1 }
 0x270   :  { %vm332_vm9 = vcmp.gt.f32.partialorder %v329_v25, 0.0  ;;  %v333_v27 = vmul.f32 0.01, %v329_v25 }
 0x272   :  { %v334_v29 = vsel %vm332_vm9, %v329_v25, %v333_v27 }
 0x273   :  { %v342_v30 = vmul.f32 %v374_v28, %v334_v29 }
 0x275   :  { %v343_v31 = vsel %vm48_vm0, %v342_v30, 0.0 }
 0x276   :  { %344 = vadd.xlane.f32.xlu0 %v343_v31 }
 0x303   :  { %v345_v33 = vpop.xlane.xlu0 %344 }
 0x304   :  { %v353_v34 = vadd.f32 %v375_v32, %v345_v33 }
 0x306   :  { %v354_v35 = vand.u32 2147483647, %v353_v34 }
 0x308   :  { %v355_v36 = vadd.f32 1e-06, %v354_v35 }
 0x30a   :  { %357 = vst.msk [vmem:[%s597_s7] sm:$0x3] %vm356_vm10, %v355_v36  ;;  %444 = vrcp.f32 %v355_v36 }
 0x314   :  { %v445_v37 = vpop.eup %444 }
 0x315   :  { %360 = vst.msk [vmem:[%s598_s8] sm:$0x3] %vm356_vm10, %v445_v37 }
 0x316   :  { %369 = vsyncpa [#allocation5], 1 }

</bundles_post_ra>
